<compile_context>
chip_gen: v7x
topology: tpu7x:2x2x1
jax: 0.10.0
libtpu: 0.0.40
codegen_flags: <defaults>
</compile_context>

<pallas_src>
import jax
import jax.numpy as jnp
from jax.experimental import pallas as pl
from jax.experimental.pallas import tpu as pltpu

_SUBLANES = 8
_LANES = 128


def _h_sigmoid_kernel(x_ref, o_ref):
    # relu6(x + 3) * (1/6); f32 compute on every generation for predictable
    # lowering (v5e has no bf16 VALU), cast back to the output dtype on store.
    x = x_ref[...].astype(jnp.float32)
    y = jnp.clip(x + 3.0, 0.0, 6.0) * jnp.float32(1.0 / 6.0)
    o_ref[...] = y.astype(o_ref.dtype)


def _tile_params():
    """Generation-aware (target_tile_bytes, vmem_limit_bytes)."""
    vmem_cap = 128 * 1024 * 1024  # conservative default: v5e/v6e-like
    try:
        cap = getattr(pltpu.get_tpu_info(), "vmem_capacity_bytes", None)
        if cap:
            vmem_cap = int(cap)
    except Exception:
        pass
    if vmem_cap <= 64 * 1024 * 1024:
        # v7x-class: 64 MiB VMEM/TC, ~3.2 TB/s HBM. 8 MiB tiles keep the
        # per-step overhead at ~5% of wall clock. Footprint:
        # 2 bufs x (in + out) x 8 MiB = 32 MiB < 48 MiB limit < 64 MiB VMEM.
        return 8 * 1024 * 1024, 48 * 1024 * 1024
    # v5e / v6e: 128 MiB physical VMEM, slower HBM; 4 MiB tiles already sit
    # at ~86% of HBM roofline. Footprint 16 MiB < 32 MiB limit.
    return 4 * 1024 * 1024, 32 * 1024 * 1024


def h_sigmoid(x):
    """Applies relu6(x + 3) / 6 elementwise via a Pallas TPU kernel.

    Accepts any shape (e.g. NCHW); returns same shape & dtype.
    """
    orig_shape = x.shape
    orig_dtype = x.dtype
    n = x.size
    if n == 0:
        return x

    itemsize = jnp.dtype(orig_dtype).itemsize
    target_tile_bytes, vmem_limit_bytes = _tile_params()

    compiler_params = pltpu.CompilerParams(
        dimension_semantics=("parallel",),
        vmem_limit_bytes=vmem_limit_bytes,
    )

    # --- common case: element count divisible by 128 -> free reshape to a
    #     lane-dense 2-D slab (rows, lanes). No pad / slice HBM passes. ------
    lanes = None
    for cand in (1024, 512, 256, 128):
        if n % cand == 0:
            lanes = cand
            break

    if lanes is not None:
        rows = n // lanes
        x2d = x.reshape(rows, lanes)
        tr = max(
            _SUBLANES,
            (target_tile_bytes // (lanes * itemsize)) // _SUBLANES * _SUBLANES,
        )
        if rows <= tr:
            tr = rows          # single full-extent block (exempt from 8-rule)
            grid = (1,)
        else:
            grid = (pl.cdiv(rows, tr),)   # partial last block is masked
        out = pl.pallas_call(
            _h_sigmoid_kernel,
            out_shape=jax.ShapeDtypeStruct((rows, lanes), orig_dtype),
            grid_spec=pltpu.PrefetchScalarGridSpec(
                num_scalar_prefetch=0,
                grid=grid,
                in_specs=[pl.BlockSpec((tr, lanes), lambda i: (i, 0))],
                out_specs=pl.BlockSpec((tr, lanes), lambda i: (i, 0)),
            ),
            compiler_params=compiler_params,
        )(x2d)
        return out.reshape(orig_shape)

    # --- ragged case (n not a multiple of 128): run directly on the flat
    #     1-D view with (8*128)-multiple blocks and a masked partial last
    #     block. Avoids the old pad + slice fallback (~3x HBM traffic). ------
    xf = x.reshape(n)
    block = (target_tile_bytes // itemsize) // (_SUBLANES * _LANES) * (_SUBLANES * _LANES)
    block = max(block, _SUBLANES * _LANES)
    if n <= block:
        block = n              # full-extent block: exempt from the 128 rule
        grid = (1,)
    else:
        grid = (pl.cdiv(n, block),)
    out = pl.pallas_call(
        _h_sigmoid_kernel,
        out_shape=jax.ShapeDtypeStruct((n,), orig_dtype),
        grid_spec=pltpu.PrefetchScalarGridSpec(
            num_scalar_prefetch=0,
            grid=grid,
            in_specs=[pl.BlockSpec((block,), lambda i: (i,))],
            out_specs=pl.BlockSpec((block,), lambda i: (i,)),
        ),
        compiler_params=compiler_params,
    )(xf)
    return out.reshape(orig_shape)


def h_sigmoid_ref(x):
    xf = x.astype(jnp.float32)
    return (jnp.clip(xf + 3.0, 0.0, 6.0) / 6.0).astype(x.dtype)


if __name__ == "__main__":
    key = jax.random.PRNGKey(0)
    k1, k2, k3 = jax.random.split(key, 3)

    # Main case: small NCHW input (aligned path, single block).
    x = jax.random.normal(key, (2, 4, 16, 16), dtype=jnp.float32) * 4.0
    y = jax.block_until_ready(h_sigmoid(x))
    assert y.shape == x.shape and y.dtype == x.dtype
    assert jnp.allclose(y, h_sigmoid_ref(x), atol=1e-6, rtol=1e-6)

    # Larger NCHW input: exercises larger lane-dense tiles on the 2-D path.
    x2 = jax.random.normal(k1, (4, 64, 56, 56), dtype=jnp.float32) * 4.0
    y2 = jax.block_until_ready(h_sigmoid(x2))
    assert jnp.allclose(y2, h_sigmoid_ref(x2), atol=1e-6, rtol=1e-6)

    # Ragged sizes: exercise the pad-free flat 1-D path.
    x3 = jax.random.normal(k2, (3, 5, 7), dtype=jnp.float32) * 4.0
    y3 = jax.block_until_ready(h_sigmoid(x3))
    assert y3.shape == x3.shape
    assert jnp.allclose(y3, h_sigmoid_ref(x3), atol=1e-6, rtol=1e-6)

    x4 = jax.random.normal(k3, (17, 129), dtype=jnp.float32) * 4.0
    y4 = jax.block_until_ready(h_sigmoid(x4))
    assert y4.shape == x4.shape
    assert jnp.allclose(y4, h_sigmoid_ref(x4), atol=1e-6, rtol=1e-6)

    # bf16 input: f32 compute inside the kernel, cast back on store.
    xb = (jax.random.normal(key, (2, 4, 16, 16), dtype=jnp.float32) * 4.0
          ).astype(jnp.bfloat16)
    yb = jax.block_until_ready(h_sigmoid(xb))
    assert yb.shape == xb.shape and yb.dtype == xb.dtype
    assert jnp.allclose(yb.astype(jnp.float32),
                        h_sigmoid_ref(xb).astype(jnp.float32),
                        atol=1e-2, rtol=1e-2)

    print("KERNEL_OK")
</pallas_src>

<mosaic_0001>
module attributes {stable_mosaic.version = 11 : i64} {
  func.func @_h_sigmoid_kernel(%arg0: i32, %arg1: memref<2x1024xf32, #tpu.memory_space<vmem>>, %arg2: memref<2x1024xf32, #tpu.memory_space<vmem>>) attributes {dimension_semantics = [#tpu.dimension_semantics<parallel>], iteration_bounds = array<i64: 1>, scalar_prefetch = 0 : i64, scratch_operands = 0 : i64, tpu.core_type = #tpu.core_type<tc>, window_params = [{transform_indices = @transform_0, window_bounds = array<i64: 2, 1024>}, {transform_indices = @transform_1, window_bounds = array<i64: 2, 1024>}]} {
    %c0 = arith.constant 0 : index
    %c0_0 = arith.constant 0 : index
    %0 = vector.load %arg1[%c0, %c0_0] : memref<2x1024xf32, #tpu.memory_space<vmem>>, vector<2x1024xf32>
    %cst = arith.constant 3.000000e+00 : f32
    %1 = vector.broadcast %cst : f32 to vector<2x1024xf32>
    %2 = arith.addf %0, %1 : vector<2x1024xf32>
    %cst_1 = arith.constant 0.000000e+00 : f32
    %cst_2 = arith.constant 6.000000e+00 : f32
    %3 = vector.broadcast %cst_1 : f32 to vector<2x1024xf32>
    %4 = arith.maximumf %3, %2 : vector<2x1024xf32>
    %5 = vector.broadcast %cst_2 : f32 to vector<2x1024xf32>
    %6 = arith.minimumf %5, %4 : vector<2x1024xf32>
    %cst_3 = arith.constant 0.166666672 : f32
    %7 = vector.broadcast %cst_3 : f32 to vector<2x1024xf32>
    %8 = arith.mulf %6, %7 : vector<2x1024xf32>
    %c0_4 = arith.constant 0 : index
    %c0_5 = arith.constant 0 : index
    %9 = vector.load %arg2[%c0_4, %c0_5] : memref<2x1024xf32, #tpu.memory_space<vmem>>, vector<2x1024xf32>
    tpu.vector_store %arg2[%c0_4, %c0_5], %8 {strides = array<i32>} : memref<2x1024xf32, #tpu.memory_space<vmem>>, vector<2x1024xf32>,
    return
  }
  func.func @transform_0(%arg0: i32) -> (i32, i32) {
    %c0_i32 = arith.constant 0 : i32
    %c0_i32_0 = arith.constant 0 : i32
    return %arg0, %c0_i32 : i32, i32
  }
  func.func @transform_1(%arg0: i32) -> (i32, i32) {
    %c0_i32 = arith.constant 0 : i32
    %c0_i32_0 = arith.constant 0 : i32
    return %arg0, %c0_i32 : i32, i32
  }
}

</mosaic_0001>

<bundles_post_ra>
// kernel: tpu_custom_call.1
= control target key start
LH: loop header
LB: loop body
LE: loop exit
PB: predicated region body
PF: predicated region fallthrough
CT: control target
= control target key end

     0   :  { %6 = vsyncpa [#allocation3], 0  ;;  %s134_s0 = inlined_call_operand.hbm [shape: f32[2,1024], index: 0, kind: input, shape index: {}]   ;;  %s135_s1 = inlined_call_operand.hbm [shape: f32[2,1024], index: 1, kind: output, shape index: {}]  }
   0x1   :  { %7 = vsyncpa [#allocation4], 0  ;;  %s98_s6 = smov [#allocation2]   ;;  %s50_s10 = scalar_lea.hbm %s134_s0, 256 }
   0x2   :  { %s14_s7 = sshll.u32 %s98_s6, 4  ;;  %p51_p0 = scmp.ne.s32.totalorder %s134_s0, %s50_s10  ;;  %s15_s7 = int_to_ptr.vmem [resolvable:$true] %s14_s7 }
   0x3   :  { %p54_p1 = scmp.lt.u32.totalorder %s50_s10, %s134_s0 }
   0x5   :  { %p56_p2 = pnand %p54_p1, %p51_p0 }
   0x7   :  { %59 = shalt.err (!%p56_p2)
}
   0x8   :  { %s60_s15 = scalar_lea.vmem %s15_s7, 256  ;;  %p65_p4 = scmp.lt.s32.totalorder %s15_s7, %s15_s7 }
   0x9   :  { %p61_p3 = scmp.ne.s32.totalorder %s15_s7, %s60_s15  ;;  %p66_p5 = scmp.lt.s32.totalorder %s60_s15, %s60_s15 }
   0xb   :  { %p67_p6 = por %p66_p5, %p65_p4 }
   0xd   :  { %p68_p7 = pnand %p67_p6, %p61_p3 }
   0xf   :  { %71 = shalt.err (!%p68_p7)
}
  0x10   :  { %17 = dma.hbm_to_vmem [thread:$0]  %s134_s0, 256, %s15_s7, [#allocation3]  }
  0x11   :  { %94 = dma.done.wait [#allocation3], 256  }
  0x12   :  { %95 = vsyncadd [#allocation3], 4294967040  ;;  %v21_v0 = vld [vmem:[#allocation2] sm:$0xff]  ;;  %v22_v1 = vld [vmem:[#allocation2 + $0x8] sm:$0xff]  ;;  %s99_s18 = smov [#allocation5]  }
  0x13   :  { %v23_v2 = vadd.f32 3.0, %v21_v0  ;;  %v24_v3 = vadd.f32 3.0, %v22_v1  ;;  %s39_s19 = sshll.u32 %s99_s18, 4  ;;  %s40_s19 = int_to_ptr.vmem [resolvable:$true] %s39_s19 }
  0x14   :  { %s72_s20 = scalar_lea.vmem %s40_s19, 256  ;;  %p77_p9 = scmp.lt.s32.totalorder %s40_s19, %s40_s19 }
  0x15   :  { %v25_v4 = vmax.f32 %v23_v2, 0.0  ;;  %v26_v5 = vmax.f32 %v24_v3, 0.0  ;;  %p73_p8 = scmp.ne.s32.totalorder %s40_s19, %s72_s20  ;;  %p78_p10 = scmp.lt.s32.totalorder %s72_s20, %s72_s20 }
  0x17   :  { %v27_v6 = vmin.f32 %v25_v4, 6.0  ;;  %v28_v7 = vmin.f32 %v26_v5, 6.0  ;;  %p79_p11 = por %p78_p10, %p77_p9 }
  0x19   :  { %v29_v8 = vmul.f32 0.16666667, %v27_v6  ;;  %v30_v9 = vmul.f32 0.16666667, %v28_v7  ;;  %p80_p12 = pnand %p79_p11, %p73_p8 }
  0x1b   :  { %31 = vst [vmem:[#allocation5] sm:$0xff] %v29_v8  ;;  %32 = vst [vmem:[#allocation5 + $0x8] sm:$0xff] %v30_v9 }
  0x1c   :  { %83 = shalt.err (!%p80_p12)
}
  0x1d   :  { %s84_s22 = scalar_lea.hbm %s135_s1, 256 }
  0x1e   :  { %p85_p13 = scmp.ne.s32.totalorder %s135_s1, %s84_s22  ;;  %p88_p0 = scmp.lt.u32.totalorder %s84_s22, %s135_s1 }
  0x20   :  { %p90_p1 = pnand %p88_p0, %p85_p13 }
  0x22   :  { %93 = shalt.err (!%p90_p1)
}
  0x23   :  { %42 = dma.vmem_to_hbm [thread:$0]  %s40_s19, 256, %s135_s1, [#allocation4]  }
  0x24   :  { %96 = dma.done.wait [#allocation4], 256  }
  0x25   :  { %97 = vsyncadd [#allocation4], 4294967040 }
  0x26   :  { %46 = vsyncpa [#allocation3], 1 }
  0x27   :  { %47 = vsyncpa [#allocation4], 1 }

</bundles_post_ra>
